<compile_context>
chip_gen: v5e
topology: v5e:2x2
jax: 0.10.0
libtpu: 0.0.40
codegen_flags: <defaults>
</compile_context>

<pallas_src>
import jax
import jax.numpy as jnp
from jax.experimental import pallas as pl
from jax.experimental.pallas import tpu as pltpu


def _round_up(n, m):
    return ((n + m - 1) // m) * m


def _cdiv(a, b):
    return (a + b - 1) // b


def mlp_kernel(x_ref, w1_ref, b1_ref, w2_ref, b2_ref, w3_ref, b3_ref,
               w4_ref, b4_ref, o_ref):
    # x arrives f32; cast to bf16 on the VPU (free filler slot) for the MXU.
    x = x_ref[...].astype(jnp.bfloat16)

    # Layer 1: (TB,20)bf16 @ (20,64)bf16 -> f32 acc, +bias, ReLU
    h = jnp.dot(x, w1_ref[...], preferred_element_type=jnp.float32)
    h = jnp.maximum(h + b1_ref[...], 0.0)

    # Layer 2: (TB,64) @ (64,256)
    h = jnp.dot(h.astype(jnp.bfloat16), w2_ref[...],
                preferred_element_type=jnp.float32)
    h = jnp.maximum(h + b2_ref[...], 0.0)

    # Layer 3: (TB,256) @ (256,32)
    h = jnp.dot(h.astype(jnp.bfloat16), w3_ref[...],
                preferred_element_type=jnp.float32)
    h = jnp.maximum(h + b3_ref[...], 0.0)

    # Layer 4 (32 -> 1): (1,32) @ (TB,32)^T on the MXU -> lane-dense (1, TB) row.
    out = jax.lax.dot_general(
        w4_ref[...], h.astype(jnp.bfloat16),
        dimension_numbers=(((1,), (1,)), ((), ())),
        preferred_element_type=jnp.float32) + b4_ref[...]

    o_ref[0] = out.astype(o_ref.dtype)          # (1, TB) slab, dense lanes


def _choose_tiling(B, tb):
    """Balanced tile size: multiple of 128, tail padding < 128 rows per tile."""
    tb = max(128, (tb // 128) * 128)
    n_tiles = _cdiv(B, tb)
    if n_tiles == 1 and B >= 1024:
        n_tiles = 2          # >=2 grid steps so "parallel" can use both v7x TCs
    TB = _round_up(_cdiv(B, n_tiles), 128)
    return n_tiles, TB


def mlp_forward(x, params, *, tb=2048):
    """x: (B, 20) float32, params from prepare_params -> (B, 1) float32."""
    w1, b1, w2, b2, w3, b3, w4, b4 = params
    B, n_in = x.shape

    n_tiles, TB = _choose_tiling(B, tb)
    B_pad = n_tiles * TB
    if B_pad != B:
        x = jnp.pad(x, ((0, B_pad - B), (0, 0)))

    const = lambda a: pl.BlockSpec(a.shape, lambda i: (0, 0))  # resident weights/biases

    out = pl.pallas_call(
        mlp_kernel,
        out_shape=jax.ShapeDtypeStruct((n_tiles, 1, TB), jnp.float32),
        grid=(n_tiles,),
        in_specs=[
            pl.BlockSpec((TB, n_in), lambda i: (i, 0)),   # x tile (f32, cast in-kernel)
            const(w1), const(b1),
            const(w2), const(b2),
            const(w3), const(b3),
            const(w4), const(b4),
        ],
        out_specs=pl.BlockSpec((1, 1, TB), lambda i: (i, 0, 0)),
        compiler_params=pltpu.CompilerParams(
            dimension_semantics=("parallel",),
            vmem_limit_bytes=32 * 1024 * 1024,
        ),
    )(x, w1, b1, w2, b2, w3, b3, w4, b4)

    return out.reshape(B_pad, 1)[:B]


def init_params(key, n_inputs=20):
    """Deterministic init mimicking nn.Linear (uniform +/- 1/sqrt(fan_in)).

    Weights stored transposed as (in, out); the last layer's weight is a (1, 32) row."""
    dims = [(n_inputs, 64), (64, 256), (256, 32), (32, 1)]
    params = []
    for li, (fan_in, fan_out) in enumerate(dims):
        key, kw, kb = jax.random.split(key, 3)
        bound = 1.0 / jnp.sqrt(fan_in)
        if li == len(dims) - 1:
            w = jax.random.uniform(kw, (1, fan_in), jnp.float32, -bound, bound)
        else:
            w = jax.random.uniform(kw, (fan_in, fan_out), jnp.float32, -bound, bound)
        b = jax.random.uniform(kb, (1, fan_out), jnp.float32, -bound, bound)
        params += [w, b]
    return tuple(params)


def prepare_params(params):
    """One-time bf16 cast of the weight matrices (biases stay f32)."""
    w1, b1, w2, b2, w3, b3, w4, b4 = params
    return (w1.astype(jnp.bfloat16), b1,
            w2.astype(jnp.bfloat16), b2,
            w3.astype(jnp.bfloat16), b3,
            w4.astype(jnp.bfloat16), b4)


def mlp_reference_f32(x, params):
    """Pure-f32 reference (matches the PyTorch module math)."""
    w1, b1, w2, b2, w3, b3, w4_row, b4 = params
    h = jnp.maximum(x @ w1 + b1, 0.0)
    h = jnp.maximum(h @ w2 + b2, 0.0)
    h = jnp.maximum(h @ w3 + b3, 0.0)
    return jnp.sum(h * w4_row, axis=-1, keepdims=True) + b4


def mlp_reference_bf16(x, params):
    """Reference matching the kernel's mixed-precision path (bf16 MXU, f32 acc)."""
    w1, b1, w2, b2, w3, b3, w4_row, b4 = params
    h = jnp.dot(x.astype(jnp.bfloat16), w1.astype(jnp.bfloat16),
                preferred_element_type=jnp.float32)
    h = jnp.maximum(h + b1, 0.0)
    h = jnp.dot(h.astype(jnp.bfloat16), w2.astype(jnp.bfloat16),
                preferred_element_type=jnp.float32)
    h = jnp.maximum(h + b2, 0.0)
    h = jnp.dot(h.astype(jnp.bfloat16), w3.astype(jnp.bfloat16),
                preferred_element_type=jnp.float32)
    h = jnp.maximum(h + b3, 0.0)
    h = h.astype(jnp.bfloat16).astype(jnp.float32)
    return jnp.sum(h * w4_row.astype(jnp.bfloat16).astype(jnp.float32),
                   axis=-1, keepdims=True) + b4


if __name__ == "__main__":
    key = jax.random.PRNGKey(0)
    key, kx = jax.random.split(key)

    batch, n_inputs = 10, 20  # non-multiple-of-8 batch exercises the padding path
    x = jax.random.normal(kx, (batch, n_inputs), dtype=jnp.float32)
    params = init_params(key, n_inputs=n_inputs)
    prepared = prepare_params(params)

    fwd = jax.jit(lambda xx: mlp_forward(xx, prepared))
    out = jax.block_until_ready(fwd(x))
    assert out.shape == (batch, 1)

    # Match against a reference using the same bf16/f32 mixed precision ...
    ref_bf16 = mlp_reference_bf16(x, params)
    assert jnp.allclose(out, ref_bf16, atol=2e-3, rtol=2e-3)
    # ... and a loose sanity check against the full-f32 module math.
    ref_f32 = mlp_reference_f32(x, params)
    assert jnp.allclose(out, ref_f32, atol=5e-2, rtol=5e-2)

    print("KERNEL_OK")
</pallas_src>

<mosaic_0001>
module attributes {stable_mosaic.version = 11 : i64} {
  func.func @mlp_kernel(%arg0: i32, %arg1: memref<128x20xf32, #tpu.memory_space<vmem>>, %arg2: memref<20x64xbf16, #tpu.memory_space<vmem>>, %arg3: memref<1x64xf32, #tpu.memory_space<vmem>>, %arg4: memref<64x256xbf16, #tpu.memory_space<vmem>>, %arg5: memref<1x256xf32, #tpu.memory_space<vmem>>, %arg6: memref<256x32xbf16, #tpu.memory_space<vmem>>, %arg7: memref<1x32xf32, #tpu.memory_space<vmem>>, %arg8: memref<1x32xbf16, #tpu.memory_space<vmem>>, %arg9: memref<1x1xf32, #tpu.memory_space<vmem>>, %arg10: memref<1x1x128xf32, #tpu.memory_space<vmem>>) attributes {dimension_semantics = [#tpu.dimension_semantics<parallel>], iteration_bounds = array<i64: 1>, scalar_prefetch = 0 : i64, scratch_operands = 0 : i64, tpu.core_type = #tpu.core_type<tc>, window_params = [{transform_indices = @transform_0, window_bounds = array<i64: 128, 20>}, {pipeline_mode = #tpu.pipeline_mode<synchronous>, transform_indices = @transform_1, window_bounds = array<i64: 20, 64>}, {pipeline_mode = #tpu.pipeline_mode<synchronous>, transform_indices = @transform_2, window_bounds = array<i64: 1, 64>}, {pipeline_mode = #tpu.pipeline_mode<synchronous>, transform_indices = @transform_3, window_bounds = array<i64: 64, 256>}, {pipeline_mode = #tpu.pipeline_mode<synchronous>, transform_indices = @transform_4, window_bounds = array<i64: 1, 256>}, {pipeline_mode = #tpu.pipeline_mode<synchronous>, transform_indices = @transform_5, window_bounds = array<i64: 256, 32>}, {pipeline_mode = #tpu.pipeline_mode<synchronous>, transform_indices = @transform_6, window_bounds = array<i64: 1, 32>}, {pipeline_mode = #tpu.pipeline_mode<synchronous>, transform_indices = @transform_7, window_bounds = array<i64: 1, 32>}, {pipeline_mode = #tpu.pipeline_mode<synchronous>, transform_indices = @transform_8, window_bounds = array<i64: 1, 1>}, {transform_indices = @transform_9, window_bounds = array<i64: 1, 1, 128>}]} {
    %c0 = arith.constant 0 : index
    %c0_0 = arith.constant 0 : index
    %0 = vector.load %arg1[%c0, %c0_0] : memref<128x20xf32, #tpu.memory_space<vmem>>, vector<128x20xf32>
    %1 = arith.truncf %0 : vector<128x20xf32> to vector<128x20xbf16>
    %c0_1 = arith.constant 0 : index
    %c0_2 = arith.constant 0 : index
    %2 = vector.load %arg2[%c0_1, %c0_2] : memref<20x64xbf16, #tpu.memory_space<vmem>>, vector<20x64xbf16>
    %cst = arith.constant dense<0.000000e+00> : vector<128x64xf32>
    %3 = tpu.matmul %1, %2, %cst {dimension_numbers = #tpu.dot_dimension_numbers<[1], [0], [0], [1], [0, 0, 1, 1], [], []>} : vector<128x20xbf16>, vector<20x64xbf16>, vector<128x64xf32> -> vector<128x64xf32>
    %c0_3 = arith.constant 0 : index
    %c0_4 = arith.constant 0 : index
    %4 = vector.load %arg3[%c0_3, %c0_4] : memref<1x64xf32, #tpu.memory_space<vmem>>, vector<1x64xf32>
    %5 = vector.broadcast %4 : vector<1x64xf32> to vector<128x64xf32>
    %6 = arith.addf %3, %5 : vector<128x64xf32>
    %cst_5 = arith.constant 0.000000e+00 : f32
    %7 = vector.broadcast %cst_5 : f32 to vector<128x64xf32>
    %8 = arith.maximumf %6, %7 : vector<128x64xf32>
    %9 = arith.truncf %8 : vector<128x64xf32> to vector<128x64xbf16>
    %c0_6 = arith.constant 0 : index
    %c0_7 = arith.constant 0 : index
    %10 = vector.load %arg4[%c0_6, %c0_7] : memref<64x256xbf16, #tpu.memory_space<vmem>>, vector<64x256xbf16>
    %cst_8 = arith.constant dense<0.000000e+00> : vector<128x256xf32>
    %11 = tpu.matmul %9, %10, %cst_8 {dimension_numbers = #tpu.dot_dimension_numbers<[1], [0], [0], [1], [0, 0, 1, 1], [], []>} : vector<128x64xbf16>, vector<64x256xbf16>, vector<128x256xf32> -> vector<128x256xf32>
    %c0_9 = arith.constant 0 : index
    %c0_10 = arith.constant 0 : index
    %12 = vector.load %arg5[%c0_9, %c0_10] : memref<1x256xf32, #tpu.memory_space<vmem>>, vector<1x256xf32>
    %13 = vector.broadcast %12 : vector<1x256xf32> to vector<128x256xf32>
    %14 = arith.addf %11, %13 : vector<128x256xf32>
    %cst_11 = arith.constant 0.000000e+00 : f32
    %15 = vector.broadcast %cst_11 : f32 to vector<128x256xf32>
    %16 = arith.maximumf %14, %15 : vector<128x256xf32>
    %17 = arith.truncf %16 : vector<128x256xf32> to vector<128x256xbf16>
    %c0_12 = arith.constant 0 : index
    %c0_13 = arith.constant 0 : index
    %18 = vector.load %arg6[%c0_12, %c0_13] : memref<256x32xbf16, #tpu.memory_space<vmem>>, vector<256x32xbf16>
    %cst_14 = arith.constant dense<0.000000e+00> : vector<128x32xf32>
    %19 = tpu.matmul %17, %18, %cst_14 {dimension_numbers = #tpu.dot_dimension_numbers<[1], [0], [0], [1], [0, 0, 1, 1], [], []>} : vector<128x256xbf16>, vector<256x32xbf16>, vector<128x32xf32> -> vector<128x32xf32>
    %c0_15 = arith.constant 0 : index
    %c0_16 = arith.constant 0 : index
    %20 = vector.load %arg7[%c0_15, %c0_16] : memref<1x32xf32, #tpu.memory_space<vmem>>, vector<1x32xf32>
    %21 = vector.broadcast %20 : vector<1x32xf32> to vector<128x32xf32>
    %22 = arith.addf %19, %21 : vector<128x32xf32>
    %cst_17 = arith.constant 0.000000e+00 : f32
    %23 = vector.broadcast %cst_17 : f32 to vector<128x32xf32>
    %24 = arith.maximumf %22, %23 : vector<128x32xf32>
    %c0_18 = arith.constant 0 : index
    %c0_19 = arith.constant 0 : index
    %25 = vector.load %arg8[%c0_18, %c0_19] : memref<1x32xbf16, #tpu.memory_space<vmem>>, vector<1x32xbf16>
    %26 = arith.truncf %24 : vector<128x32xf32> to vector<128x32xbf16>
    %cst_20 = arith.constant dense<0.000000e+00> : vector<1x128xf32>
    %27 = tpu.matmul %25, %26, %cst_20 {dimension_numbers = #tpu.dot_dimension_numbers<[1], [1], [0], [0], [0, 0, 1, 0], [], []>} : vector<1x32xbf16>, vector<128x32xbf16>, vector<1x128xf32> -> vector<1x128xf32>
    %c0_21 = arith.constant 0 : index
    %c0_22 = arith.constant 0 : index
    %28 = vector.load %arg9[%c0_21, %c0_22] : memref<1x1xf32, #tpu.memory_space<vmem>>, vector<1x1xf32>
    %29 = vector.broadcast %28 : vector<1x1xf32> to vector<1x128xf32>
    %30 = arith.addf %27, %29 : vector<1x128xf32>
    %c0_23 = arith.constant 0 : index
    %c0_24 = arith.constant 0 : index
    %c0_25 = arith.constant 0 : index
    %31 = vector.load %arg10[%c0_23, %c0_24, %c0_25] : memref<1x1x128xf32, #tpu.memory_space<vmem>>, vector<1x1x128xf32>
    %32 = vector.shape_cast %31 : vector<1x1x128xf32> to vector<1x128xf32>
    %33 = vector.shape_cast %30 : vector<1x128xf32> to vector<1x1x128xf32>
    tpu.vector_store %arg10[%c0_23, %c0_24, %c0_25], %33 {strides = array<i32>} : memref<1x1x128xf32, #tpu.memory_space<vmem>>, vector<1x1x128xf32>,
    return
  }
  func.func @transform_0(%arg0: i32) -> (i32, i32) {
    %c0_i32 = arith.constant 0 : i32
    %c0_i32_0 = arith.constant 0 : i32
    return %arg0, %c0_i32 : i32, i32
  }
  func.func @transform_1(%arg0: i32) -> (i32, i32) {
    %c0_i32 = arith.constant 0 : i32
    %c0_i32_0 = arith.constant 0 : i32
    %c0_i32_1 = arith.constant 0 : i32
    return %c0_i32, %c0_i32_0 : i32, i32
  }
  func.func @transform_2(%arg0: i32) -> (i32, i32) {
    %c0_i32 = arith.constant 0 : i32
    %c0_i32_0 = arith.constant 0 : i32
    %c0_i32_1 = arith.constant 0 : i32
    return %c0_i32, %c0_i32_0 : i32, i32
  }
  func.func @transform_3(%arg0: i32) -> (i32, i32) {
    %c0_i32 = arith.constant 0 : i32
    %c0_i32_0 = arith.constant 0 : i32
    %c0_i32_1 = arith.constant 0 : i32
    return %c0_i32, %c0_i32_0 : i32, i32
  }
  func.func @transform_4(%arg0: i32) -> (i32, i32) {
    %c0_i32 = arith.constant 0 : i32
    %c0_i32_0 = arith.constant 0 : i32
    %c0_i32_1 = arith.constant 0 : i32
    return %c0_i32, %c0_i32_0 : i32, i32
  }
  func.func @transform_5(%arg0: i32) -> (i32, i32) {
    %c0_i32 = arith.constant 0 : i32
    %c0_i32_0 = arith.constant 0 : i32
    %c0_i32_1 = arith.constant 0 : i32
    return %c0_i32, %c0_i32_0 : i32, i32
  }
  func.func @transform_6(%arg0: i32) -> (i32, i32) {
    %c0_i32 = arith.constant 0 : i32
    %c0_i32_0 = arith.constant 0 : i32
    %c0_i32_1 = arith.constant 0 : i32
    return %c0_i32, %c0_i32_0 : i32, i32
  }
  func.func @transform_7(%arg0: i32) -> (i32, i32) {
    %c0_i32 = arith.constant 0 : i32
    %c0_i32_0 = arith.constant 0 : i32
    %c0_i32_1 = arith.constant 0 : i32
    return %c0_i32, %c0_i32_0 : i32, i32
  }
  func.func @transform_8(%arg0: i32) -> (i32, i32) {
    %c0_i32 = arith.constant 0 : i32
    %c0_i32_0 = arith.constant 0 : i32
    %c0_i32_1 = arith.constant 0 : i32
    return %c0_i32, %c0_i32_0 : i32, i32
  }
  func.func @transform_9(%arg0: i32) -> (i32, i32, i32) {
    %c0_i32 = arith.constant 0 : i32
    %c0_i32_0 = arith.constant 0 : i32
    %c0_i32_1 = arith.constant 0 : i32
    return %arg0, %c0_i32, %c0_i32_0 : i32, i32, i32
  }
}

</mosaic_0001>

<bundles_post_ra>
// kernel: _lambda_.1
= control target key start
LH: loop header
LB: loop body
LE: loop exit
PB: predicated region body
PF: predicated region fallthrough
CT: control target
= control target key end

     0   :  { %s1207_s0 = inlined_call_operand.vmem [shape: f32[128,20], index: 0, kind: input, shape index: {}]   ;;  %s1208_s1 = inlined_call_operand.vmem [shape: bf16[20,64], index: 1, kind: input, shape index: {}]   ;;  %s1209_s2 = inlined_call_operand.vmem [shape: f32[1,64], index: 2, kind: input, shape index: {}]   ;;  %s1210_s3 = inlined_call_operand.hbm [shape: bf16[64,256], index: 3, kind: input, shape index: {}]   ;;  %s1211_s4 = inlined_call_operand.vmem [shape: f32[1,256], index: 4, kind: input, shape index: {}]   ;;  %s1212_s5 = inlined_call_operand.vmem [shape: bf16[256,32], index: 5, kind: input, shape index: {}]   ;;  %s1213_s6 = inlined_call_operand.vmem [shape: f32[1,32], index: 6, kind: input, shape index: {}]   ;;  %s1214_s7 = inlined_call_operand.vmem [shape: bf16[1,32], index: 7, kind: input, shape index: {}]   ;;  %s1215_s8 = inlined_call_operand.<no memory space> [shape: f32[1,1], index: 8, kind: input, shape index: {}]   ;;  %s1216_s9 = inlined_call_operand.vmem [shape: f32[1,1,128], index: 9, kind: output, shape index: {}]  }
   0x1   :  { %v14_v0 = vstv %s1215_s8 }
   0x2   :  { %15 = vst [vmem:[#allocation2] sm:$0x1] %v14_v0 }
   0x3   :  { %16 = vsyncpa [#allocation4], 0  ;;  %s27_s13 = sshll.u32 %s1210_s3, 4  ;;  %s916_s14 = smov [#allocation3]   ;;  %s28_s13 = int_to_ptr.hbm [resolvable:$true] %s27_s13 }
   0x4   :  { %s29_s15 = sshll.u32 %s916_s14, 4  ;;  %s917_s16 = smov 128   ;;  %s30_s15 = int_to_ptr.vmem [resolvable:$true] %s29_s15 }
   0x5   :  { %s918_s17 = smov 8  }
   0x6   :  { %35 = dma.hbm_to_vmem [thread:$0]  %s28_s13, 1024, %s30_s15, [#allocation4], %s917_s16, %s917_s16, %s918_s17  }
   0x7   :  { %914 = dma.done.wait [#allocation4], 1024  }
   0x8   :  { %915 = vsyncadd [#allocation4], 4294966272  ;;  %v77_v1 = vld [vmem:[%s1208_s1 + $0x8] sm:$0x3]  ;;  %vm116_vm0 = vcmask 1041408   ;;  %v852_v4 = vld [vmem:[%s1208_s1] sm:$0xff] }
   0x9   :  { %v87_v2 = vunpack.c.l.b16 %v77_v1  ;;  %v51_v6 = vld [vmem:[%s1207_s0] sm:$0xff]  ;;  %v52_v7 = vld [vmem:[%s1207_s0 + $0x8] sm:$0xff]  ;;  %vm91_vm1 = vcmask 162816   ;;  %v65_v15 = vld [vmem:[%s1207_s0 + $0x70] sm:$0xff]  ;;  %vm247_vm2 = vcmask 523264   ;;  %vm680_vm3 = vcmask 261120  }
   0xa   :  { %v55_v8 = vld [vmem:[%s1207_s0 + $0x20] sm:$0xff]  ;;  %v56_v9 = vld [vmem:[%s1207_s0 + $0x28] sm:$0xff]  ;;  %v67_v12 = vpack.c.bf16 %v52_v7, %v51_v6  ;;  %v66_v16 = vld [vmem:[%s1207_s0 + $0x78] sm:$0xff] }
   0xb   :  { %v89_v3 = vpack.c.b16 %v87_v2, %v87_v2  ;;  %v59_v10 = vld [vmem:[%s1207_s0 + $0x40] sm:$0xff]  ;;  %v60_v11 = vld [vmem:[%s1207_s0 + $0x48] sm:$0xff]  ;;  %v69_v13 = vpack.c.bf16 %v56_v9, %v55_v8  ;;  %v74_v17 = vpack.c.bf16 %v66_v16, %v65_v15  ;;  %v53_v18 = vld [vmem:[%s1207_s0 + $0x10] sm:$0xff] }
   0xc   :  { %v71_v14 = vpack.c.bf16 %v60_v11, %v59_v10  ;;  %v54_v19 = vld [vmem:[%s1207_s0 + $0x18] sm:$0xff]  ;;  %v57_v20 = vld [vmem:[%s1207_s0 + $0x30] sm:$0xff]  ;;  %v63_v27 = vld [vmem:[%s1207_s0 + $0x60] sm:$0xff] }
   0xd   :  { %v118_v5 = vsel %vm116_vm0, %v89_v3, 0  ;;  %v58_v21 = vld [vmem:[%s1207_s0 + $0x38] sm:$0xff]  ;;  %v61_v22 = vld [vmem:[%s1207_s0 + $0x50] sm:$0xff]  ;;  %v68_v24 = vpack.c.bf16 %v54_v19, %v53_v18  ;;  %v64_v28 = vld [vmem:[%s1207_s0 + $0x68] sm:$0xff] }
   0xe   :  { %126 = vmatpush.bf16.msra.mxu0 %v118_v5  ;;  %877 = vmatpush.bf16.msra.mxu1 %v118_v5  ;;  %v62_v23 = vld [vmem:[%s1207_s0 + $0x58] sm:$0xff]  ;;  %v70_v25 = vpack.c.bf16 %v58_v21, %v57_v20  ;;  %v73_v29 = vpack.c.bf16 %v64_v28, %v63_v27  ;;  %v765_v30 = vld [vmem:[#allocation3 + $0x30] sm:$0xf]  ;;  %v757_v36 = vld [vmem:[#allocation3 + $0x20] sm:$0xf] }
   0xf   :  { %878 = vmatpush.bf16.msra.mxu2 %v118_v5  ;;  %879 = vmatpush.bf16.msra.mxu3 %v118_v5  ;;  %v72_v26 = vpack.c.bf16 %v62_v23, %v61_v22  ;;  %v860_v31 = vld [vmem:[#allocation3 + $0x34] sm:$0xf0]  ;;  %v859_v32 = vld [vmem:[#allocation3 + $0x34] sm:$0xf]  ;;  %v767_v34 = vld [vmem:[#allocation3 + $0x38] sm:$0xf0] }
  0x10   :  { %v766_v33 = vor.u32 %v860_v31, %v765_v30  ;;  %v770_v35 = vor.u32 %v859_v32, %v767_v34  ;;  %v858_v37 = vld [vmem:[#allocation3 + $0x24] sm:$0xf0]  ;;  %v857_v38 = vld [vmem:[#allocation3 + $0x24] sm:$0xf]  ;;  %v759_v40 = vld [vmem:[#allocation3 + $0x28] sm:$0xf0] }
  0x11   :  { %v758_v39 = vor.u32 %v858_v37, %v757_v36  ;;  %v762_v41 = vor.u32 %v857_v38, %v759_v40  ;;  %v749_v42 = vld [vmem:[#allocation3 + $0x10] sm:$0xf]  ;;  %v856_v43 = vld [vmem:[#allocation3 + $0x14] sm:$0xf0]  ;;  %v855_v44 = vld [vmem:[#allocation3 + $0x14] sm:$0xf] }
  0x12   :  { %127 = vmatpush.bf16.msra.mxu0 %v852_v4  ;;  %880 = vmatpush.bf16.msra.mxu1 %v852_v4  ;;  %v750_v45 = vor.u32 %v856_v43, %v749_v42  ;;  %v751_v46 = vld [vmem:[#allocation3 + $0x18] sm:$0xf0]  ;;  %v741_v48 = vld [vmem:[#allocation3] sm:$0xf]  ;;  %v854_v49 = vld [vmem:[#allocation3 + $0x4] sm:$0xf0] }
  0x13   :  { %881 = vmatpush.bf16.msra.mxu2 %v852_v4  ;;  %882 = vmatpush.bf16.msra.mxu3 %v852_v4  ;;  %v754_v47 = vor.u32 %v855_v44, %v751_v46  ;;  %v853_v50 = vld [vmem:[#allocation3 + $0x4] sm:$0xf]  ;;  %v742_v51 = vor.u32 %v854_v49, %v741_v48  ;;  %v743_v52 = vld [vmem:[#allocation3 + $0x8] sm:$0xf0]  ;;  %v1041_v55 = vld [vmem:[%s1209_s2] ss:$0 sm:$0xff] }
  0x14   :  { %v746_v53 = vor.u32 %v853_v50, %v743_v52  ;;  %v868_v28 = vld [vmem:[%s1212_s5 + $0x38] sm:$0xff]  ;;  %v866_v37 = vld [vmem:[%s1212_s5 + $0x28] sm:$0xff]  ;;  %v875_v38 = vld [vmem:[%s1212_s5 + $0x70] sm:$0xff] }
  0x15   :  { %731 = vmatmul.msk.bf16.vlgmr.msra.gmra.mxu0 %vm91_vm1, %v67_v12  ;;  %733 = vmatmul.msk.bf16.vlgmr.msra.gmra.mxu1 %vm91_vm1, %v69_v13  ;;  %v876_v36 = vld [vmem:[%s1212_s5 + $0x78] sm:$0xff]  ;;  %v865_v40 = vld [vmem:[%s1212_s5 + $0x20] sm:$0xff]  ;;  %v874_v43 = vld [vmem:[%s1212_s5 + $0x68] sm:$0xff] }
  0x16   :  { %735 = vmatmul.msk.bf16.vlgmr.msra.gmra.mxu2 %vm91_vm1, %v71_v14  ;;  %738 = vmatmul.msk.bf16.vlgmr.msra.gmra.mxu3 %vm91_vm1, %v74_v17  ;;  %v873_v48 = vld [vmem:[%s1212_s5 + $0x60] sm:$0xff]  ;;  %v863_v50 = vld [vmem:[%s1212_s5 + $0x10] sm:$0xff] }
  0x17   :  { %276 = vmatpush.bf16.msrb.mxu1 %v766_v33  ;;  %325 = vmatpush.bf16.msrb.mxu2 %v770_v35  ;;  %v867_v35 = vld [vmem:[%s1212_s5 + $0x30] sm:$0xff] }
  0x18   :  { %550 = vmatpush.bf16.msrb.mxu3 %v868_v28  ;;  %599 = vmatpush.bf16.msrb.mxu0 %v876_v36 }
  0x1b   :  { %277 = vmatpush.bf16.msrb.mxu1 %v758_v39  ;;  %326 = vmatpush.bf16.msrb.mxu2 %v762_v41 }
  0x1c   :  { %551 = vmatpush.bf16.msrb.mxu3 %v867_v35  ;;  %600 = vmatpush.bf16.msrb.mxu0 %v875_v38 }
  0x1f   :  { %278 = vmatpush.bf16.msrb.mxu1 %v750_v45  ;;  %327 = vmatpush.bf16.msrb.mxu2 %v754_v47  ;;  %v864_v47 = vld [vmem:[%s1212_s5 + $0x18] sm:$0xff] }
  0x20   :  { %552 = vmatpush.bf16.msrb.mxu3 %v866_v37  ;;  %601 = vmatpush.bf16.msrb.mxu0 %v874_v43 }
  0x23   :  { %279 = vmatpush.bf16.msrb.mxu1 %v742_v51  ;;  %328 = vmatpush.bf16.msrb.mxu2 %v746_v53  ;;  %v872_v51 = vld [vmem:[%s1212_s5 + $0x58] sm:$0xff]  ;;  %v862_v53 = vld [vmem:[%s1212_s5 + $0x8] sm:$0xff] }
  0x24   :  { %553 = vmatpush.bf16.msrb.mxu3 %v865_v40  ;;  %602 = vmatpush.bf16.msrb.mxu0 %v873_v48 }
  0x25   :  { %732 = vmatmul.msk.bf16.gmra.mxu0 %vm91_vm1, %v68_v24  ;;  %734 = vmatmul.msk.bf16.gmra.mxu1 %vm91_vm1, %v70_v25 }
  0x26   :  { %736 = vmatmul.msk.bf16.gmra.mxu2 %vm91_vm1, %v72_v26 }
  0x28   :  { %554 = vmatpush.bf16.msrb.mxu3 %v864_v47  ;;  %603 = vmatpush.bf16.msrb.mxu0 %v872_v51 }
  0x2c   :  { %555 = vmatpush.bf16.msrb.mxu3 %v863_v50 }
  0x30   :  { %556 = vmatpush.bf16.msrb.mxu3 %v862_v53 }
  0x36   :  { %737 = vmatmul.msk.bf16.gmra.mxu2 %vm91_vm1, %v73_v29 }
  0x92   :  { %v129_v54 = vpop.f32.mrf.mxu0  ;;  %v139_v63 = vpop.f32.mrf.mxu1 }
  0x93   :  { %v130_v56 = vadd.f32 %v1041_v55, %v129_v54  ;;  %v140_v7 = vadd.f32 %v1041_v55, %v139_v63  ;;  %v871_v54 = vld [vmem:[%s1212_s5 + $0x50] sm:$0xff] }
  0x94   :  { %604 = vmatpush.bf16.msrb.mxu0 %v871_v54 }
  0x95   :  { %v169_v59 = vmax.f32 %v130_v56, 0.0  ;;  %v173_v10 = vmax.f32 %v140_v7, 0.0 }
  0x99   :  { %v149_v13 = vpop.f32.mrf.mxu2  ;;  %v164_v44 = vpop.f32.mrf.mxu3 }
  0x9a   :  { %v131_v57 = vpop.f32.mrf.mxu0  ;;  %v141_v6 = vpop.f32.mrf.mxu1  ;;  %v150_v22 = vadd.f32 %v1041_v55, %v149_v13  ;;  %v165_v56 = vadd.f32 %v1041_v55, %v164_v44 }
  0x9b   :  { %v132_v58 = vadd.f32 %v1041_v55, %v131_v57  ;;  %v142_v8 = vadd.f32 %v1041_v55, %v141_v6 }
  0x9c   :  { %v177_v24 = vmax.f32 %v150_v22, 0.0 }
  0x9d   :  { %v170_v60 = vmax.f32 %v132_v58, 0.0  ;;  %v174_v11 = vmax.f32 %v142_v8, 0.0  ;;  %v861_v58 = vld [vmem:[%s1212_s5] sm:$0xff] }
  0x9e   :  { %557 = vmatpush.bf16.msrb.mxu3 %v861_v58 }
  0x9f   :  { %v185_v61 = vpack.c.bf16 %v170_v60, %v169_v59  ;;  %v187_v12 = vpack.c.bf16 %v174_v11, %v173_v10  ;;  %v870_v59 = vld [vmem:[%s1212_s5 + $0x48] sm:$0xff]  ;;  %v183_v60 = vmax.f32 %v165_v56, 0.0 }
  0xa0   :  { %605 = vmatpush.bf16.msrb.mxu0 %v870_v59 }
  0xa1   :  { %771 = vmatmul.msk.bf16.vlgmr.msrb.gmra.mxu1 %vm247_vm2, %v185_v61  ;;  %779 = vmatmul.msk.bf16.vlgmr.msrb.gmra.mxu2 %vm247_vm2, %v185_v61  ;;  %v151_v19 = vpop.f32.mrf.mxu2  ;;  %v166_v52 = vpop.f32.mrf.mxu3 }
  0xa2   :  { %v134_v62 = vpop.f32.mrf.mxu0  ;;  %v144_v9 = vpop.f32.mrf.mxu1  ;;  %v152_v23 = vadd.f32 %v1041_v55, %v151_v19  ;;  %v167_v57 = vadd.f32 %v1041_v55, %v166_v52 }
  0xa3   :  { %v135_v0 = vadd.f32 %v1041_v55, %v134_v62  ;;  %v145_v15 = vadd.f32 %v1041_v55, %v144_v9  ;;  %v869_v62 = vld [vmem:[%s1212_s5 + $0x40] sm:$0xff] }
  0xa4   :  { %v178_v25 = vmax.f32 %v152_v23, 0.0  ;;  %v184_v61 = vmax.f32 %v167_v57, 0.0  ;;  %606 = vmatpush.bf16.msrb.mxu0 %v869_v62 }
  0xa5   :  { %v171_v3 = vmax.f32 %v135_v0, 0.0  ;;  %v175_v17 = vmax.f32 %v145_v15, 0.0 }
  0xa6   :  { %v189_v26 = vpack.c.bf16 %v178_v25, %v177_v24  ;;  %v192_v63 = vpack.c.bf16 %v184_v61, %v183_v60 }
  0xa9   :  { %v154_v21 = vpop.f32.mrf.mxu2 }
  0xaa   :  { %v136_v1 = vpop.f32.mrf.mxu0  ;;  %v146_v14 = vpop.f32.mrf.mxu1  ;;  %v155_v29 = vadd.f32 %v1041_v55, %v154_v21 }
  0xab   :  { %v137_v2 = vadd.f32 %v1041_v55, %v136_v1  ;;  %v147_v16 = vadd.f32 %v1041_v55, %v146_v14 }
  0xac   :  { %v179_v32 = vmax.f32 %v155_v29, 0.0 }
  0xad   :  { %v172_v4 = vmax.f32 %v137_v2, 0.0  ;;  %v176_v18 = vmax.f32 %v147_v16, 0.0 }
  0xaf   :  { %v186_v5 = vpack.c.bf16 %v172_v4, %v171_v3  ;;  %v188_v20 = vpack.c.bf16 %v176_v18, %v175_v17 }
  0xb1   :  { %772 = vmatmul.msk.bf16.gmra.mxu1 %vm247_vm2, %v186_v5  ;;  %780 = vmatmul.msk.bf16.gmra.mxu2 %vm247_vm2, %v186_v5  ;;  %v156_v27 = vpop.f32.mrf.mxu2 }
  0xb2   :  { %v157_v30 = vadd.f32 %v1041_v55, %v156_v27 }
  0xb4   :  { %v180_v33 = vmax.f32 %v157_v30, 0.0 }
  0xb6   :  { %v190_v34 = vpack.c.bf16 %v180_v33, %v179_v32 }
  0xb9   :  { %v159_v31 = vpop.f32.mrf.mxu2 }
  0xba   :  { %v160_v41 = vadd.f32 %v1041_v55, %v159_v31 }
  0xbc   :  { %v181_v45 = vmax.f32 %v160_v41, 0.0 }
  0xc1   :  { %773 = vmatmul.msk.bf16.gmra.mxu1 %vm247_vm2, %v187_v12  ;;  %781 = vmatmul.msk.bf16.gmra.mxu2 %vm247_vm2, %v187_v12  ;;  %v161_v39 = vpop.f32.mrf.mxu2 }
  0xc2   :  { %v162_v42 = vadd.f32 %v1041_v55, %v161_v39  ;;  %v201_v55 = vld [vmem:[%s1211_s4] sm:$0x3] }
  0xc3   :  { %v1126_v1 = vperm.slane %v201_v55, 0  ;;  %v1129_v5 = vperm.slane %v201_v55, 1 }
  0xc4   :  { %v182_v46 = vmax.f32 %v162_v42, 0.0 }
  0xc6   :  { %v191_v49 = vpack.c.bf16 %v182_v46, %v181_v45 }
  0xd1   :  { %774 = vmatmul.msk.bf16.gmra.mxu1 %vm247_vm2, %v188_v20  ;;  %782 = vmatmul.msk.bf16.gmra.mxu2 %vm247_vm2, %v188_v20 }
  0xe1   :  { %775 = vmatmul.msk.bf16.gmra.mxu1 %vm247_vm2, %v189_v26  ;;  %783 = vmatmul.msk.bf16.gmra.mxu2 %vm247_vm2, %v189_v26 }
  0xf1   :  { %776 = vmatmul.msk.bf16.gmra.mxu1 %vm247_vm2, %v190_v34  ;;  %784 = vmatmul.msk.bf16.gmra.mxu2 %vm247_vm2, %v190_v34 }
 0x101   :  { %777 = vmatmul.msk.bf16.gmra.mxu1 %vm247_vm2, %v191_v49  ;;  %785 = vmatmul.msk.bf16.gmra.mxu2 %vm247_vm2, %v191_v49 }
 0x111   :  { %778 = vmatmul.msk.bf16.gmra.mxu1 %vm247_vm2, %v192_v63  ;;  %786 = vmatmul.msk.bf16.gmra.mxu2 %vm247_vm2, %v192_v63 }
 0x11e   :  { %v281_v0 = vpop.f32.mrf.mxu1 }
 0x11f   :  { %v282_v3 = vadd.f32 %v281_v0, %v1126_v1 }
 0x121   :  { %v370_v7 = vmax.f32 %v282_v3, 0.0 }
 0x124   :  { %v330_v2 = vpop.f32.mrf.mxu2 }
 0x125   :  { %v331_v9 = vadd.f32 %v330_v2, %v1129_v5 }
 0x126   :  { %v283_v4 = vpop.f32.mrf.mxu1 }
 0x127   :  { %v284_v6 = vadd.f32 %v283_v4, %v1126_v1  ;;  %v371_v14 = vmax.f32 %v331_v9, 0.0 }
 0x129   :  { %v372_v8 = vmax.f32 %v284_v6, 0.0 }
 0x12b   :  { %v402_v10 = vpack.c.bf16 %v372_v8, %v370_v7 }
 0x12c   :  { %v332_v11 = vpop.f32.mrf.mxu2 }
 0x12d   :  { %v333_v12 = vadd.f32 %v332_v11, %v1129_v5  ;;  %558 = vmatmul.bf16.vlgmr.msrb.gmra.mxu3 %v402_v10 }
 0x12e   :  { %v286_v13 = vpop.f32.mrf.mxu1 }
 0x12f   :  { %v373_v15 = vmax.f32 %v333_v12, 0.0  ;;  %v287_v18 = vadd.f32 %v286_v13, %v1126_v1 }
 0x131   :  { %v403_v16 = vpack.c.bf16 %v373_v15, %v371_v14  ;;  %v374_v21 = vmax.f32 %v287_v18, 0.0 }
 0x133   :  { %607 = vmatmul.bf16.vlgmr.msrb.gmra.mxu0 %v403_v16 }
 0x134   :  { %v335_v17 = vpop.f32.mrf.mxu2 }
 0x135   :  { %v336_v23 = vadd.f32 %v335_v17, %v1129_v5 }
 0x136   :  { %v288_v19 = vpop.f32.mrf.mxu1 }
 0x137   :  { %v289_v20 = vadd.f32 %v288_v19, %v1126_v1  ;;  %v375_v28 = vmax.f32 %v336_v23, 0.0 }
 0x139   :  { %v376_v22 = vmax.f32 %v289_v20, 0.0 }
 0x13b   :  { %v404_v24 = vpack.c.bf16 %v376_v22, %v374_v21 }
 0x13c   :  { %v337_v25 = vpop.f32.mrf.mxu2 }
 0x13d   :  { %v338_v26 = vadd.f32 %v337_v25, %v1129_v5  ;;  %563 = vmatmul.bf16.gmra.mxu3 %v404_v24 }
 0x13e   :  { %v291_v27 = vpop.f32.mrf.mxu1 }
 0x13f   :  { %v377_v29 = vmax.f32 %v338_v26, 0.0  ;;  %v292_v32 = vadd.f32 %v291_v27, %v1126_v1 }
 0x141   :  { %v405_v30 = vpack.c.bf16 %v377_v29, %v375_v28  ;;  %v378_v35 = vmax.f32 %v292_v32, 0.0 }
 0x143   :  { %612 = vmatmul.bf16.gmra.mxu0 %v405_v30 }
 0x144   :  { %v340_v31 = vpop.f32.mrf.mxu2 }
 0x145   :  { %v341_v37 = vadd.f32 %v340_v31, %v1129_v5 }
 0x146   :  { %v293_v33 = vpop.f32.mrf.mxu1 }
 0x147   :  { %v294_v34 = vadd.f32 %v293_v33, %v1126_v1  ;;  %v379_v42 = vmax.f32 %v341_v37, 0.0 }
 0x149   :  { %v380_v36 = vmax.f32 %v294_v34, 0.0 }
 0x14b   :  { %v406_v38 = vpack.c.bf16 %v380_v36, %v378_v35 }
 0x14c   :  { %v342_v39 = vpop.f32.mrf.mxu2 }
 0x14d   :  { %v343_v40 = vadd.f32 %v342_v39, %v1129_v5  ;;  %568 = vmatmul.bf16.gmra.mxu3 %v406_v38 }
 0x14e   :  { %v296_v41 = vpop.f32.mrf.mxu1 }
 0x14f   :  { %v381_v43 = vmax.f32 %v343_v40, 0.0  ;;  %v297_v46 = vadd.f32 %v296_v41, %v1126_v1 }
 0x151   :  { %v407_v44 = vpack.c.bf16 %v381_v43, %v379_v42  ;;  %v382_v49 = vmax.f32 %v297_v46, 0.0 }
 0x153   :  { %617 = vmatmul.bf16.gmra.mxu0 %v407_v44 }
 0x154   :  { %v345_v45 = vpop.f32.mrf.mxu2 }
 0x155   :  { %v346_v51 = vadd.f32 %v345_v45, %v1129_v5 }
 0x156   :  { %v298_v47 = vpop.f32.mrf.mxu1 }
 0x157   :  { %v299_v48 = vadd.f32 %v298_v47, %v1126_v1  ;;  %v383_v57 = vmax.f32 %v346_v51, 0.0 }
 0x159   :  { %v384_v50 = vmax.f32 %v299_v48, 0.0 }
 0x15b   :  { %v408_v52 = vpack.c.bf16 %v384_v50, %v382_v49 }
 0x15c   :  { %v347_v53 = vpop.f32.mrf.mxu2 }
 0x15d   :  { %v348_v54 = vadd.f32 %v347_v53, %v1129_v5  ;;  %573 = vmatmul.bf16.gmra.mxu3 %v408_v52  ;;  %v1165_v52 = vld [vmem:[%s1213_s6] ss:$0 sm:$0xff] }
 0x15e   :  { %v301_v56 = vpop.f32.mrf.mxu1 }
 0x15f   :  { %v385_v58 = vmax.f32 %v348_v54, 0.0  ;;  %v302_v61 = vadd.f32 %v301_v56, %v1126_v1 }
 0x161   :  { %v409_v59 = vpack.c.bf16 %v385_v58, %v383_v57  ;;  %v386_v55 = vmax.f32 %v302_v61, 0.0 }
 0x163   :  { %622 = vmatmul.bf16.gmra.mxu0 %v409_v59 }
 0x164   :  { %v350_v60 = vpop.f32.mrf.mxu2 }
 0x165   :  { %v351_v2 = vadd.f32 %v350_v60, %v1129_v5 }
 0x166   :  { %v303_v62 = vpop.f32.mrf.mxu1 }
 0x167   :  { %v304_v63 = vadd.f32 %v303_v62, %v1126_v1  ;;  %v387_v8 = vmax.f32 %v351_v2, 0.0 }
 0x169   :  { %v388_v0 = vmax.f32 %v304_v63, 0.0 }
 0x16b   :  { %v410_v3 = vpack.c.bf16 %v388_v0, %v386_v55 }
 0x16c   :  { %v352_v4 = vpop.f32.mrf.mxu2 }
 0x16d   :  { %v353_v6 = vadd.f32 %v352_v4, %v1129_v5  ;;  %578 = vmatmul.bf16.gmra.mxu3 %v410_v3 }
 0x16e   :  { %v306_v7 = vpop.f32.mrf.mxu1 }
 0x16f   :  { %v389_v9 = vmax.f32 %v353_v6, 0.0  ;;  %v307_v12 = vadd.f32 %v306_v7, %v1126_v1 }
 0x171   :  { %v411_v10 = vpack.c.bf16 %v389_v9, %v387_v8  ;;  %v390_v15 = vmax.f32 %v307_v12, 0.0 }
 0x173   :  { %627 = vmatmul.bf16.gmra.mxu0 %v411_v10 }
 0x174   :  { %v355_v11 = vpop.f32.mrf.mxu2 }
 0x175   :  { %v356_v17 = vadd.f32 %v355_v11, %v1129_v5 }
 0x176   :  { %v308_v13 = vpop.f32.mrf.mxu1 }
 0x177   :  { %v309_v14 = vadd.f32 %v308_v13, %v1126_v1  ;;  %v391_v22 = vmax.f32 %v356_v17, 0.0 }
 0x179   :  { %v392_v16 = vmax.f32 %v309_v14, 0.0 }
 0x17b   :  { %v412_v18 = vpack.c.bf16 %v392_v16, %v390_v15 }
 0x17c   :  { %v357_v19 = vpop.f32.mrf.mxu2 }
 0x17d   :  { %v358_v20 = vadd.f32 %v357_v19, %v1129_v5  ;;  %583 = vmatmul.bf16.gmra.mxu3 %v412_v18 }
 0x17e   :  { %v311_v21 = vpop.f32.mrf.mxu1 }
 0x17f   :  { %v393_v23 = vmax.f32 %v358_v20, 0.0  ;;  %v312_v26 = vadd.f32 %v311_v21, %v1126_v1 }
 0x181   :  { %v413_v24 = vpack.c.bf16 %v393_v23, %v391_v22  ;;  %v394_v29 = vmax.f32 %v312_v26, 0.0 }
 0x183   :  { %632 = vmatmul.bf16.gmra.mxu0 %v413_v24 }
 0x184   :  { %v360_v25 = vpop.f32.mrf.mxu2 }
 0x185   :  { %v361_v31 = vadd.f32 %v360_v25, %v1129_v5 }
 0x186   :  { %v313_v27 = vpop.f32.mrf.mxu1 }
 0x187   :  { %v314_v28 = vadd.f32 %v313_v27, %v1126_v1  ;;  %v395_v36 = vmax.f32 %v361_v31, 0.0 }
 0x189   :  { %v396_v30 = vmax.f32 %v314_v28, 0.0 }
 0x18b   :  { %v414_v32 = vpack.c.bf16 %v396_v30, %v394_v29 }
 0x18c   :  { %v362_v33 = vpop.f32.mrf.mxu2 }
 0x18d   :  { %v363_v34 = vadd.f32 %v362_v33, %v1129_v5  ;;  %588 = vmatmul.bf16.gmra.mxu3 %v414_v32 }
 0x18e   :  { %v316_v35 = vpop.f32.mrf.mxu1 }
 0x18f   :  { %v397_v37 = vmax.f32 %v363_v34, 0.0  ;;  %v317_v40 = vadd.f32 %v316_v35, %v1126_v1 }
 0x191   :  { %v415_v38 = vpack.c.bf16 %v397_v37, %v395_v36  ;;  %v398_v43 = vmax.f32 %v317_v40, 0.0 }
 0x193   :  { %637 = vmatmul.bf16.gmra.mxu0 %v415_v38 }
 0x194   :  { %v365_v39 = vpop.f32.mrf.mxu2 }
 0x195   :  { %v366_v45 = vadd.f32 %v365_v39, %v1129_v5 }
 0x196   :  { %v318_v41 = vpop.f32.mrf.mxu1 }
 0x197   :  { %v319_v42 = vadd.f32 %v318_v41, %v1126_v1  ;;  %v399_v49 = vmax.f32 %v366_v45, 0.0 }
 0x199   :  { %v400_v44 = vmax.f32 %v319_v42, 0.0 }
 0x19b   :  { %v416_v46 = vpack.c.bf16 %v400_v44, %v398_v43 }
 0x19c   :  { %v367_v47 = vpop.f32.mrf.mxu2 }
 0x19d   :  { %v368_v48 = vadd.f32 %v367_v47, %v1129_v5  ;;  %593 = vmatmul.bf16.gmra.mxu3 %v416_v46 }
 0x19f   :  { %v401_v50 = vmax.f32 %v368_v48, 0.0 }
 0x1a1   :  { %v417_v51 = vpack.c.bf16 %v401_v50, %v399_v49 }
 0x1a3   :  { %642 = vmatmul.bf16.gmra.mxu0 %v417_v51 }
 0x1b0   :  { %v559_v53 = vpop.f32.mrf.mxu3  ;;  %v608_v1 = vpop.f32.mrf.mxu0 }
 0x1b1   :  { %v560_v54 = vadd.f32 %v1165_v52, %v559_v53 }
 0x1b3   :  { %v609_v56 = vadd.f32 %v608_v1, %v560_v54 }
 0x1b5   :  { %v648_v60 = vmax.f32 %v609_v56, 0.0 }
 0x1b8   :  { %v561_v57 = vpop.f32.mrf.mxu3  ;;  %v610_v58 = vpop.f32.mrf.mxu0 }
 0x1b9   :  { %v562_v59 = vadd.f32 %v1165_v52, %v561_v57 }
 0x1bb   :  { %v611_v5 = vadd.f32 %v610_v58, %v562_v59 }
 0x1bd   :  { %v649_v61 = vmax.f32 %v611_v5, 0.0 }
 0x1bf   :  { %v1169_v62 = vpack.c.bf16 %v649_v61, %v648_v60 }
 0x1c0   :  { %v564_v63 = vpop.f32.mrf.mxu3  ;;  %v613_v55 = vpop.f32.mrf.mxu0 }
 0x1c1   :  { %v565_v0 = vadd.f32 %v1165_v52, %v564_v63 }
 0x1c3   :  { %v614_v2 = vadd.f32 %v613_v55, %v565_v0 }
 0x1c5   :  { %v650_v8 = vmax.f32 %v614_v2, 0.0 }
 0x1c8   :  { %v566_v3 = vpop.f32.mrf.mxu3  ;;  %v615_v4 = vpop.f32.mrf.mxu0 }
 0x1c9   :  { %v567_v6 = vadd.f32 %v1165_v52, %v566_v3 }
 0x1cb   :  { %v616_v7 = vadd.f32 %v615_v4, %v567_v6 }
 0x1cd   :  { %v651_v9 = vmax.f32 %v616_v7, 0.0 }
 0x1cf   :  { %v1173_v10 = vpack.c.bf16 %v651_v9, %v650_v8 }
 0x1d0   :  { %v569_v11 = vpop.f32.mrf.mxu3  ;;  %v618_v12 = vpop.f32.mrf.mxu0 }
 0x1d1   :  { %v570_v13 = vadd.f32 %v1165_v52, %v569_v11 }
 0x1d3   :  { %v619_v14 = vadd.f32 %v618_v12, %v570_v13 }
 0x1d5   :  { %v652_v19 = vmax.f32 %v619_v14, 0.0 }
 0x1d8   :  { %v571_v15 = vpop.f32.mrf.mxu3  ;;  %v620_v16 = vpop.f32.mrf.mxu0 }
 0x1d9   :  { %v572_v17 = vadd.f32 %v1165_v52, %v571_v15 }
 0x1db   :  { %v621_v18 = vadd.f32 %v620_v16, %v572_v17 }
 0x1dd   :  { %v653_v20 = vmax.f32 %v621_v18, 0.0 }
 0x1df   :  { %v1177_v21 = vpack.c.bf16 %v653_v20, %v652_v19 }
 0x1e0   :  { %v574_v22 = vpop.f32.mrf.mxu3  ;;  %v623_v23 = vpop.f32.mrf.mxu0 }
 0x1e1   :  { %v575_v24 = vadd.f32 %v1165_v52, %v574_v22  ;;  %v673_v22 = vld [vmem:[#allocation2] sm:$0x1] }
 0x1e3   :  { %v624_v25 = vadd.f32 %v623_v23, %v575_v24  ;;  %v691_v23 = vsel %vm680_vm3, %v1177_v21, 0  ;;  %v688_v24 = vsel %vm680_vm3, %v1173_v10, 0 }
 0x1e5   :  { %v654_v30 = vmax.f32 %v624_v25, 0.0  ;;  %v685_v25 = vsel %vm680_vm3, %v1169_v62, 0 }
 0x1e8   :  { %v576_v26 = vpop.f32.mrf.mxu3  ;;  %v625_v27 = vpop.f32.mrf.mxu0 }
 0x1e9   :  { %v577_v28 = vadd.f32 %v1165_v52, %v576_v26  ;;  %v664_v26 = vld [vmem:[%s1214_s7] sm:$0x1] }
 0x1eb   :  { %v626_v29 = vadd.f32 %v625_v27, %v577_v28 }
 0x1ed   :  { %v655_v31 = vmax.f32 %v626_v29, 0.0 }
 0x1ef   :  { %v668_v32 = vpack.c.bf16 %v655_v31, %v654_v30 }
 0x1f0   :  { %v579_v33 = vpop.f32.mrf.mxu3  ;;  %v628_v34 = vpop.f32.mrf.mxu0 }
 0x1f1   :  { %v580_v35 = vadd.f32 %v1165_v52, %v579_v33  ;;  %v694_v20 = vsel %vm680_vm3, %v668_v32, 0 }
 0x1f3   :  { %v629_v36 = vadd.f32 %v628_v34, %v580_v35 }
 0x1f5   :  { %v656_v41 = vmax.f32 %v629_v36, 0.0 }
 0x1f8   :  { %v581_v37 = vpop.f32.mrf.mxu3  ;;  %v630_v38 = vpop.f32.mrf.mxu0 }
 0x1f9   :  { %v582_v39 = vadd.f32 %v1165_v52, %v581_v37 }
 0x1fb   :  { %v631_v40 = vadd.f32 %v630_v38, %v582_v39 }
 0x1fd   :  { %v657_v42 = vmax.f32 %v631_v40, 0.0 }
 0x1ff   :  { %v669_v43 = vpack.c.bf16 %v657_v42, %v656_v41 }
 0x200   :  { %v584_v44 = vpop.f32.mrf.mxu3  ;;  %v633_v45 = vpop.f32.mrf.mxu0 }
 0x201   :  { %v585_v8 = vadd.f32 %v1165_v52, %v584_v44  ;;  %v697_v19 = vsel %vm680_vm3, %v669_v43, 0 }
 0x203   :  { %v634_v13 = vadd.f32 %v633_v45, %v585_v8 }
 0x205   :  { %v658_v16 = vmax.f32 %v634_v13, 0.0 }
 0x208   :  { %v586_v46 = vpop.f32.mrf.mxu3  ;;  %v635_v47 = vpop.f32.mrf.mxu0 }
 0x209   :  { %v587_v4 = vadd.f32 %v1165_v52, %v586_v46 }
 0x20b   :  { %v636_v11 = vadd.f32 %v635_v47, %v587_v4 }
 0x20d   :  { %v659_v14 = vmax.f32 %v636_v11, 0.0 }
 0x20f   :  { %v670_v17 = vpack.c.bf16 %v659_v14, %v658_v16 }
 0x210   :  { %v589_v48 = vpop.f32.mrf.mxu3  ;;  %v638_v49 = vpop.f32.mrf.mxu0 }
 0x211   :  { %v590_v60 = vadd.f32 %v1165_v52, %v589_v48  ;;  %v700_v18 = vsel %vm680_vm3, %v670_v17, 0 }
 0x213   :  { %v639_v2 = vadd.f32 %v638_v49, %v590_v60 }
 0x215   :  { %v660_v9 = vmax.f32 %v639_v2, 0.0 }
 0x218   :  { %v591_v50 = vpop.f32.mrf.mxu3  ;;  %v640_v51 = vpop.f32.mrf.mxu0 }
 0x219   :  { %v592_v57 = vadd.f32 %v1165_v52, %v591_v50 }
 0x21b   :  { %v641_v63 = vadd.f32 %v640_v51, %v592_v57 }
 0x21d   :  { %v661_v6 = vmax.f32 %v641_v63, 0.0 }
 0x21f   :  { %v671_v12 = vpack.c.bf16 %v661_v6, %v660_v9 }
 0x220   :  { %v594_v53 = vpop.f32.mrf.mxu3  ;;  %v643_v1 = vpop.f32.mrf.mxu0 }
 0x221   :  { %v595_v54 = vadd.f32 %v1165_v52, %v594_v53  ;;  %v703_v15 = vsel %vm680_vm3, %v671_v12, 0 }
 0x223   :  { %v644_v58 = vadd.f32 %v643_v1, %v595_v54 }
 0x225   :  { %v662_v55 = vmax.f32 %v644_v58, 0.0 }
 0x228   :  { %v596_v56 = vpop.f32.mrf.mxu3  ;;  %v645_v5 = vpop.f32.mrf.mxu0 }
 0x229   :  { %v597_v59 = vadd.f32 %v1165_v52, %v596_v56  ;;  %v919_v52 = vmov 0  }
 0x22a   :  { %887 = vset.pattern.permute.xlu0 %v919_v52 }
 0x22b   :  { %v646_v61 = vadd.f32 %v645_v5, %v597_v59  ;;  %676 = vperm.xlu0 %887, %v673_v22  }
 0x22d   :  { %v663_v0 = vmax.f32 %v646_v61, 0.0 }
 0x22f   :  { %v672_v3 = vpack.c.bf16 %v663_v0, %v662_v55 }
 0x231   :  { %v706_v7 = vsel %vm680_vm3, %v672_v3, 0 }
 0x232   :  { %708 = vmatpush.bf16.xpose.msra.mxu1 %v706_v7 }
 0x23a   :  { %709 = vmatpush.bf16.xpose.msra.mxu1 %v703_v15 }
 0x242   :  { %710 = vmatpush.bf16.xpose.msra.mxu1 %v700_v18 }
 0x24a   :  { %711 = vmatpush.bf16.xpose.msra.mxu1 %v697_v19 }
 0x252   :  { %712 = vmatpush.bf16.xpose.msra.mxu1 %v694_v20 }
 0x25a   :  { %713 = vmatpush.bf16.xpose.msra.mxu1 %v691_v23 }
 0x262   :  { %714 = vmatpush.bf16.xpose.msra.mxu1 %v688_v24 }
 0x26a   :  { %715 = vmatpush.bf16.xpose.msra.mxu1 %v685_v25 }
 0x271   :  { %851 = vmatmul.msk.bf16.vlgmr.msra.gmra.mxu1 %vm680_vm3, %v664_v26 }
 0x29d   :  { %v677_v27 = vpop.permute.xlu0 %676 }
 0x29e   :  { %v679_v28 = vperm.slane %v677_v27, 0 }
 0x2ee   :  { %v717_v29 = vpop.f32.mrf.mxu1 }
 0x2ef   :  { %v718_v30 = vadd.f32 %v717_v29, %v679_v28 }
 0x2f1   :  { %721 = vst [vmem:[%s1216_s9] sm:$0x1] %v718_v30 }
 0x2f6   :  { %v719_v10 = vpop.f32.mrf.mxu1 }
 0x2f7   :  { %726 = vsyncpa [#allocation4], 1 }

</bundles_post_ra>
